<compile_context>
chip_gen: v7x
topology: tpu7x:2x2x1
jax: 0.10.0
libtpu: 0.0.40
codegen_flags: <defaults>
</compile_context>

<pallas_src>
import functools

import jax
import jax.numpy as jnp
from jax.experimental import pallas as pl
from jax.experimental.pallas import tpu as pltpu


def _round_up(n, m):
    return -(-n // m) * m


# --------------------------------------------------------------------------
# Pallas kernel: fused block-diagonal MLP, all three heads in 3 matmuls.
# --------------------------------------------------------------------------
def _fused_kernel(x_ref, w_ref, b_ref, out_ref, *, fp, d1, d2, d3, nc, approx):
    r2 = fp
    r3 = fp + d1

    x = x_ref[...]                                               # bf16 [B, fp]

    # Layer 1: fused [main | binary | outpatient] first Linear, bias+ReLU in f32.
    h = jnp.dot(x, w_ref[0:fp, 0:d1], preferred_element_type=jnp.float32)
    h = jnp.maximum(h + b_ref[0:1, 0:d1], 0.0)

    # Layer 2: block-diagonal (BN folded in), bias+ReLU in f32.
    h = jnp.dot(h.astype(jnp.bfloat16), w_ref[r2:r2 + d1, 0:d2],
                preferred_element_type=jnp.float32)
    h = jnp.maximum(h + b_ref[1:2, 0:d2], 0.0)

    # Layer 3: block-diagonal (BN folded in) -> fused logits [B, d3].
    # Lane layout: 0..nc-1 main logits, nc -> (l0-l1), nc+1 -> (l1-l0),
    # nc+2 -> outpatient logit, rest zero.
    z = jnp.dot(h.astype(jnp.bfloat16), w_ref[r3:r3 + d2, 0:d3],
                preferred_element_type=jnp.float32)
    z = z + b_ref[2:3, 0:d3]

    # Full-width sigmoid (EUP exp + reciprocal), single VPU select on the three
    # probability lanes.  softmax([l0,l1]) == (sigmoid(l0-l1), sigmoid(l1-l0)),
    # so no cross-lane shuffle / concatenate / 1-lane slicing is needed.
    neg_exp = jnp.exp(-z)
    if approx:
        # ~1e-3 relative error in the probabilities; set approx_sigmoid=False
        # in the wrapper for exact division.
        sig = pl.reciprocal(1.0 + neg_exp, approx=True)
    else:
        sig = 1.0 / (1.0 + neg_exp)
    col = jax.lax.broadcasted_iota(jnp.int32, z.shape, dimension=1)
    out = jnp.where((col >= nc) & (col < nc + 3), sig, z)
    out_ref[...] = out.astype(out_ref.dtype)                     # unmasked 128-lane store


# --------------------------------------------------------------------------
# Parameter construction (deterministic, PyTorch-style uniform init).
# --------------------------------------------------------------------------
def _linear_params(key, in_dim, out_dim):
    """PyTorch nn.Linear default init: U(-1/sqrt(in), 1/sqrt(in)); stored [in,out]."""
    kw, kb = jax.random.split(key)
    bound = 1.0 / jnp.sqrt(jnp.float32(in_dim))
    w = jax.random.uniform(kw, (in_dim, out_dim), jnp.float32, -bound, bound)
    b = jax.random.uniform(kb, (1, out_dim), jnp.float32, -bound, bound)
    return w, b


def _bn_eval_params(dim, eps=1e-5):
    """Eval-mode BatchNorm1d (gamma=1, beta=0, mean=0, var=1) as scale/shift."""
    gamma = jnp.ones((1, dim), jnp.float32)
    beta = jnp.zeros((1, dim), jnp.float32)
    running_mean = jnp.zeros((1, dim), jnp.float32)
    running_var = jnp.ones((1, dim), jnp.float32)
    scale = gamma / jnp.sqrt(running_var + eps)
    shift = beta - running_mean * scale
    return scale, shift


def init_params(feature_dim, num_classes=17, seed=42):
    f = feature_dim
    keys = jax.random.split(jax.random.PRNGKey(seed), 8)
    # main classifier
    mW1, mb1 = _linear_params(keys[0], f, f)
    ms1, msh1 = _bn_eval_params(f)
    mW2, mb2 = _linear_params(keys[1], f, f // 2)
    ms2, msh2 = _bn_eval_params(f // 2)
    mW3, mb3 = _linear_params(keys[2], f // 2, num_classes)
    # binary 3vs7 classifier
    bW1, bb1 = _linear_params(keys[3], f, f // 2)
    bs1, bsh1 = _bn_eval_params(f // 2)
    bW2, bb2 = _linear_params(keys[4], f // 2, f // 4)
    bW3, bb3 = _linear_params(keys[5], f // 4, 2)
    # outpatient scorer
    oW1, ob1 = _linear_params(keys[6], f, f // 4)
    oW2, ob2 = _linear_params(keys[7], f // 4, f // 8)
    oW3, ob3 = _linear_params(jax.random.PRNGKey(seed + 1), f // 8, 1)

    return (
        mW1, mb1, ms1, msh1, mW2, mb2, ms2, msh2, mW3, mb3,
        bW1, bb1, bs1, bsh1, bW2, bb2, bW3, bb3,
        oW1, ob1, oW2, ob2, oW3, ob3,
    )


def _block_diag(*mats):
    rows = sum(m.shape[0] for m in mats)
    cols = sum(m.shape[1] for m in mats)
    out = jnp.zeros((rows, cols), jnp.float32)
    r = c = 0
    for m in mats:
        out = out.at[r:r + m.shape[0], c:c + m.shape[1]].set(m)
        r += m.shape[0]
        c += m.shape[1]
    return out


def _packed_dims(feature_dim, num_classes):
    f = feature_dim
    n1 = f + f // 2 + f // 4
    n2 = f // 2 + f // 4 + f // 8
    n3 = num_classes + 3
    fp = _round_up(f, 16)              # bf16 sublane-pack alignment for row offsets
    d1 = _round_up(n1, 128)            # every layer width lane-dense (128 multiple)
    d2 = _round_up(n2, 128)
    d3 = _round_up(n3, 128)
    return f, n1, n2, n3, fp, d1, d2, d3


def pack_params(params, feature_dim, num_classes):
    """Fold BN into the following Linear, fuse heads block-diagonally, rewrite
    the binary head's last Linear as (l0-l1, l1-l0) so softmax == per-lane
    sigmoid, and pack everything into ONE lane/sublane-aligned bf16 weight
    buffer plus a tiny f32 bias buffer."""
    (mW1, mb1, ms1, msh1, mW2, mb2, ms2, msh2, mW3, mb3,
     bW1, bb1, bs1, bsh1, bW2, bb2, bW3, bb3,
     oW1, ob1, oW2, ob2, oW3, ob3) = params
    f, n1, n2, n3, fp, d1, d2, d3 = _packed_dims(feature_dim, num_classes)

    # Fold eval-mode BN (y = h*s + sh, then Linear) into the next Linear.
    mW2f = mW2 * ms1.reshape(-1, 1)
    mb2f = mb2 + msh1 @ mW2
    mW3f = mW3 * ms2.reshape(-1, 1)
    mb3f = mb3 + msh2 @ mW3
    bW2f = bW2 * bs1.reshape(-1, 1)
    bb2f = bb2 + bsh1 @ bW2

    # Binary head last Linear -> logit differences so softmax == per-lane sigmoid.
    bW3d = jnp.stack([bW3[:, 0] - bW3[:, 1], bW3[:, 1] - bW3[:, 0]], axis=1)
    bb3d = jnp.stack([bb3[0, 0] - bb3[0, 1], bb3[0, 1] - bb3[0, 0]])[None, :]

    # Fused block-diagonal layers.
    W1 = jnp.concatenate([mW1, bW1, oW1], axis=1)       # [f,  n1]
    b1 = jnp.concatenate([mb1, bb1, ob1], axis=1)
    W2 = _block_diag(mW2f, bW2f, oW2)                   # [n1, n2]
    b2 = jnp.concatenate([mb2f, bb2f, ob2], axis=1)
    W3 = _block_diag(mW3f, bW3d, oW3)                   # [n2, n3]
    b3 = jnp.concatenate([mb3f, bb3d, ob3], axis=1)

    cols = max(d1, d2, d3)
    rows = fp + d1 + d2                                  # each block 16-row aligned

    wbuf = jnp.zeros((rows, cols), jnp.float32)
    wbuf = wbuf.at[0:f, 0:n1].set(W1)
    wbuf = wbuf.at[fp:fp + n1, 0:n2].set(W2)
    wbuf = wbuf.at[fp + d1:fp + d1 + n2, 0:n3].set(W3)

    bbuf = jnp.zeros((8, cols), jnp.float32)
    bbuf = bbuf.at[0, 0:n1].set(b1[0])
    bbuf = bbuf.at[1, 0:n2].set(b2[0])
    bbuf = bbuf.at[2, 0:n3].set(b3[0])

    return wbuf.astype(jnp.bfloat16), bbuf               # weights bf16, biases f32


# --------------------------------------------------------------------------
# Wrapper: single pallas_call; bf16 x stream, lane-dense 128-wide output.
# --------------------------------------------------------------------------
@functools.partial(jax.jit, static_argnames=("num_classes", "approx_sigmoid"))
def class3vs7_forward(x, w_buf, b_buf, num_classes=17, approx_sigmoid=True):
    batch, f = x.shape
    nc = num_classes
    _, n1, n2, n3, fp, d1, d2, d3 = _packed_dims(f, nc)

    # bf16 + lane-pad the dominant input stream.
    xb = x.astype(jnp.bfloat16)
    if fp != f:
        xb = jnp.pad(xb, ((0, 0), (0, fp - f)))

    # Large batch tile (amortizes ~0.35us/step pipeline overhead), >=2 grid
    # steps whenever batch > 8 so both v7x TensorCores get work; multiple of 8;
    # capped at 2048 rows so x(2-buf)+activations+output stay well under VMEM
    # on every generation.
    block_b = max(8, min(2048, _round_up(pl.cdiv(batch, 2), 8)))
    grid = (pl.cdiv(batch, block_b),)

    kernel = functools.partial(_fused_kernel, fp=fp, d1=d1, d2=d2, d3=d3,
                               nc=nc, approx=approx_sigmoid)

    flops = 2 * batch * (fp * d1 + d1 * d2 + d2 * d3)
    bytes_accessed = (xb.size * 2 + batch * d3 * 4
                      + w_buf.size * w_buf.dtype.itemsize + b_buf.size * 4)
    cost = pl.CostEstimate(flops=flops, transcendentals=batch * d3,
                           bytes_accessed=bytes_accessed)

    fused = pl.pallas_call(
        kernel,
        out_shape=jax.ShapeDtypeStruct((batch, d3), jnp.float32),
        grid=grid,
        in_specs=[
            pl.BlockSpec((block_b, fp), lambda i: (i, 0)),
            pl.BlockSpec(w_buf.shape, lambda i: (0, 0)),   # grid-invariant
            pl.BlockSpec(b_buf.shape, lambda i: (0, 0)),   # grid-invariant
        ],
        out_specs=pl.BlockSpec((block_b, d3), lambda i: (i, 0)),
        compiler_params=pltpu.CompilerParams(
            dimension_semantics=("parallel",),
            vmem_limit_bytes=48 * 1024 * 1024,
        ),
        cost_estimate=cost,
    )(xb, w_buf, b_buf)

    main_logits = fused[:, 0:nc]
    binary_probs = fused[:, nc:nc + 2]
    outpatient_score = fused[:, nc + 2:nc + 3]
    return main_logits, binary_probs, outpatient_score


# --------------------------------------------------------------------------
# Pure-JAX reference (unfused, explicit BN) for a sanity check.
# --------------------------------------------------------------------------
def _reference_forward(x, params):
    (mW1, mb1, ms1, msh1, mW2, mb2, ms2, msh2, mW3, mb3,
     bW1, bb1, bs1, bsh1, bW2, bb2, bW3, bb3,
     oW1, ob1, oW2, ob2, oW3, ob3) = params
    relu = lambda v: jnp.maximum(v, 0.0)

    h = relu(x @ mW1 + mb1) * ms1 + msh1
    h = relu(h @ mW2 + mb2) * ms2 + msh2
    main_logits = h @ mW3 + mb3

    h = relu(x @ bW1 + bb1) * bs1 + bsh1
    h = relu(h @ bW2 + bb2)
    binary = jax.nn.softmax(h @ bW3 + bb3, axis=1)

    h = relu(x @ oW1 + ob1)
    h = relu(h @ oW2 + ob2)
    score = jax.nn.sigmoid(h @ oW3 + ob3)
    return main_logits, binary, score


if __name__ == "__main__":
    feature_dim = 32
    num_classes = 17
    batch = 10   # deliberately NOT a multiple of the 8-row block: exercises the
                 # 2-step grid and the masked partial-block writeback.

    key = jax.random.PRNGKey(0)
    x = jax.random.normal(key, (batch, feature_dim), jnp.float32)

    params = init_params(feature_dim, num_classes=num_classes, seed=42)
    w_buf, b_buf = pack_params(params, feature_dim, num_classes)

    main_logits, binary_probs, outp_score = jax.block_until_ready(
        class3vs7_forward(x, w_buf, b_buf, num_classes=num_classes)
    )

    # Sanity check against the pure-JAX (unfused, f32) reference.
    ref_main, ref_bin, ref_score = _reference_forward(x, params)
    assert main_logits.shape == (batch, num_classes)
    assert binary_probs.shape == (batch, 2)
    assert outp_score.shape == (batch, 1)
    # bf16 matmuls -> ~1e-2 tolerance on logits; approx reciprocal -> ~1e-3 on probs.
    assert jnp.allclose(main_logits, ref_main, atol=2e-2, rtol=2e-2)
    assert jnp.allclose(binary_probs, ref_bin, atol=1e-2, rtol=1e-2)
    assert jnp.allclose(outp_score, ref_score, atol=1e-2, rtol=1e-2)
    # softmax rows sum to 1 (up to approx-reciprocal error on each lane).
    assert jnp.allclose(jnp.sum(binary_probs, axis=1), 1.0, atol=5e-3)

    print("KERNEL_OK")
</pallas_src>

<mosaic_0001>
module attributes {stable_mosaic.version = 11 : i64} {
  func.func @_fused_kernel(%arg0: i32, %arg1: memref<8x32xbf16, #tpu.memory_space<vmem>>, %arg2: memref<288x128xbf16, #tpu.memory_space<vmem>>, %arg3: memref<8x128xf32, #tpu.memory_space<vmem>>, %arg4: memref<8x128xf32, #tpu.memory_space<vmem>>) attributes {dimension_semantics = [#tpu.dimension_semantics<parallel>], iteration_bounds = array<i64: 2>, scalar_prefetch = 0 : i64, scratch_operands = 0 : i64, tpu.core_type = #tpu.core_type<tc>, window_params = [{transform_indices = @transform_0, window_bounds = array<i64: 8, 32>}, {pipeline_mode = #tpu.pipeline_mode<synchronous>, transform_indices = @transform_1, window_bounds = array<i64: 288, 128>}, {pipeline_mode = #tpu.pipeline_mode<synchronous>, transform_indices = @transform_2, window_bounds = array<i64: 8, 128>}, {transform_indices = @transform_3, window_bounds = array<i64: 8, 128>}]} {
    %c0 = arith.constant 0 : index
    %c0_0 = arith.constant 0 : index
    %0 = vector.load %arg1[%c0, %c0_0] : memref<8x32xbf16, #tpu.memory_space<vmem>>, vector<8x32xbf16>
    %c0_1 = arith.constant 0 : index
    %c0_2 = arith.constant 0 : index
    %1 = vector.load %arg2[%c0_1, %c0_2] : memref<288x128xbf16, #tpu.memory_space<vmem>>, vector<32x128xbf16>
    %cst = arith.constant dense<0.000000e+00> : vector<8x128xf32>
    %2 = tpu.matmul %0, %1, %cst {dimension_numbers = #tpu.dot_dimension_numbers<[1], [0], [0], [1], [0, 0, 1, 1], [], []>} : vector<8x32xbf16>, vector<32x128xbf16>, vector<8x128xf32> -> vector<8x128xf32>
    %c0_3 = arith.constant 0 : index
    %c0_4 = arith.constant 0 : index
    %3 = vector.load %arg3[%c0_3, %c0_4] : memref<8x128xf32, #tpu.memory_space<vmem>>, vector<1x128xf32>
    %4 = vector.broadcast %3 : vector<1x128xf32> to vector<8x128xf32>
    %5 = arith.addf %2, %4 : vector<8x128xf32>
    %cst_5 = arith.constant 0.000000e+00 : f32
    %6 = vector.broadcast %cst_5 : f32 to vector<8x128xf32>
    %7 = arith.maximumf %5, %6 : vector<8x128xf32>
    %8 = arith.truncf %7 : vector<8x128xf32> to vector<8x128xbf16>
    %c32 = arith.constant 32 : index
    %c0_6 = arith.constant 0 : index
    %9 = vector.load %arg2[%c32, %c0_6] : memref<288x128xbf16, #tpu.memory_space<vmem>>, vector<128x128xbf16>
    %cst_7 = arith.constant dense<0.000000e+00> : vector<8x128xf32>
    %10 = tpu.matmul %8, %9, %cst_7 {dimension_numbers = #tpu.dot_dimension_numbers<[1], [0], [0], [1], [0, 0, 1, 1], [], []>} : vector<8x128xbf16>, vector<128x128xbf16>, vector<8x128xf32> -> vector<8x128xf32>
    %c1 = arith.constant 1 : index
    %c0_8 = arith.constant 0 : index
    %11 = vector.load %arg3[%c1, %c0_8] : memref<8x128xf32, #tpu.memory_space<vmem>>, vector<1x128xf32>
    %12 = vector.broadcast %11 : vector<1x128xf32> to vector<8x128xf32>
    %13 = arith.addf %10, %12 : vector<8x128xf32>
    %cst_9 = arith.constant 0.000000e+00 : f32
    %14 = vector.broadcast %cst_9 : f32 to vector<8x128xf32>
    %15 = arith.maximumf %13, %14 : vector<8x128xf32>
    %16 = arith.truncf %15 : vector<8x128xf32> to vector<8x128xbf16>
    %c160 = arith.constant 160 : index
    %c0_10 = arith.constant 0 : index
    %17 = vector.load %arg2[%c160, %c0_10] : memref<288x128xbf16, #tpu.memory_space<vmem>>, vector<128x128xbf16>
    %cst_11 = arith.constant dense<0.000000e+00> : vector<8x128xf32>
    %18 = tpu.matmul %16, %17, %cst_11 {dimension_numbers = #tpu.dot_dimension_numbers<[1], [0], [0], [1], [0, 0, 1, 1], [], []>} : vector<8x128xbf16>, vector<128x128xbf16>, vector<8x128xf32> -> vector<8x128xf32>
    %c2 = arith.constant 2 : index
    %c0_12 = arith.constant 0 : index
    %19 = vector.load %arg3[%c2, %c0_12] : memref<8x128xf32, #tpu.memory_space<vmem>>, vector<1x128xf32>
    %20 = vector.broadcast %19 : vector<1x128xf32> to vector<8x128xf32>
    %21 = arith.addf %18, %20 : vector<8x128xf32>
    %cst_13 = arith.constant 0.000000e+00 : f32
    %22 = vector.broadcast %cst_13 : f32 to vector<8x128xf32>
    %23 = arith.subf %22, %21 : vector<8x128xf32>
    %24 = math.exp %23 : vector<8x128xf32>
    %cst_14 = arith.constant 1.000000e+00 : f32
    %25 = vector.broadcast %cst_14 : f32 to vector<8x128xf32>
    %26 = arith.addf %25, %24 : vector<8x128xf32>
    %27 = tpu.reciprocal %26 {approx = true} : vector<8x128xf32> -> vector<8x128xf32>
    %28 = tpu.iota {dimensions = array<i32: 1>} : vector<8x128xi32>
    %c17_i32 = arith.constant 17 : i32
    %29 = vector.broadcast %c17_i32 : i32 to vector<8x128xi32>
    %30 = arith.cmpi sge, %28, %29 : vector<8x128xi32>
    %c20_i32 = arith.constant 20 : i32
    %31 = vector.broadcast %c20_i32 : i32 to vector<8x128xi32>
    %32 = arith.cmpi slt, %28, %31 : vector<8x128xi32>
    %33 = arith.andi %30, %32 : vector<8x128xi1>
    %34 = arith.select %33, %27, %21 : vector<8x128xi1>, vector<8x128xf32>
    %c0_15 = arith.constant 0 : index
    %c0_16 = arith.constant 0 : index
    %35 = vector.load %arg4[%c0_15, %c0_16] : memref<8x128xf32, #tpu.memory_space<vmem>>, vector<8x128xf32>
    tpu.vector_store %arg4[%c0_15, %c0_16], %34 {strides = array<i32>} : memref<8x128xf32, #tpu.memory_space<vmem>>, vector<8x128xf32>,
    return
  }
  func.func @transform_0(%arg0: i32) -> (i32, i32) {
    %c0_i32 = arith.constant 0 : i32
    %c0_i32_0 = arith.constant 0 : i32
    return %arg0, %c0_i32 : i32, i32
  }
  func.func @transform_1(%arg0: i32) -> (i32, i32) {
    %c0_i32 = arith.constant 0 : i32
    %c0_i32_0 = arith.constant 0 : i32
    %c0_i32_1 = arith.constant 0 : i32
    return %c0_i32, %c0_i32_0 : i32, i32
  }
  func.func @transform_2(%arg0: i32) -> (i32, i32) {
    %c0_i32 = arith.constant 0 : i32
    %c0_i32_0 = arith.constant 0 : i32
    %c0_i32_1 = arith.constant 0 : i32
    return %c0_i32, %c0_i32_0 : i32, i32
  }
  func.func @transform_3(%arg0: i32) -> (i32, i32) {
    %c0_i32 = arith.constant 0 : i32
    %c0_i32_0 = arith.constant 0 : i32
    return %arg0, %c0_i32 : i32, i32
  }
}

</mosaic_0001>

<bundles_post_ra>
// kernel: class3vs7_forward.1
= control target key start
LH: loop header
LB: loop body
LE: loop exit
PB: predicated region body
PF: predicated region fallthrough
CT: control target
= control target key end

     0   :  { %8 = vsyncpa [#allocation3], 0  ;;  %s759_s12 = smov 0   ;;  %s852_s0 = inlined_call_operand.vmem [shape: bf16[10,32], index: 0, kind: input, shape index: {}]   ;;  %s853_s1 = inlined_call_operand.hbm [shape: bf16[288,128], index: 1, kind: input, shape index: {}]   ;;  %s854_s2 = inlined_call_operand.vmem [shape: f32[8,128], index: 2, kind: input, shape index: {}]   ;;  %s855_s3 = inlined_call_operand.vmem [shape: f32[10,128], index: 3, kind: output, shape index: {}]  }
   0x1 LB: > { %s765_s13 = sadd.s32 4294967295, %s732_s12   ;;  %p549_p0 = scmp.ge.s32.totalorder %s732_s12, 1  ;;  %s732_s12 = sphi %s759_s12, %s14_s12  }
   0x2   : > { %p113_p1 = scmp.lt.s32.totalorder %s732_s12, 3  ;;  %s734_s14 = smov [#allocation2]  }
   0x3   : > { %s125_s15 = sshll.u32 %s734_s14, 4  ;;  %p856_p3 = scmp.eq.s32.totalorder %s765_s13, 0  ;;  %s126_s15 = int_to_ptr.vmem [resolvable:$true] %s125_s15 }
   0x4   : > { %p769_p2 = pnand %p549_p0, %p113_p1  ;;  %s694_s20 = scalar_lea.hbm %s853_s1, 2304 }
   0x5   : > { %p695_p6 = scmp.ne.s32.totalorder %s853_s1, %s694_s20  ;;  %p701_p10 = scmp.lt.u32.totalorder %s694_s20, %s853_s1 }
   0x6   : > { %s858_s16 = scalar_select %p769_p2, 1, 0 }
   0x7   : > { %p653_p4 = pneg %p769_p2 }
   0x9   : > { %p778_p5 = pnand %p856_p3, %p653_p4 }
   0xb   : > { %p696_p7 = pneg %p778_p5 }
   0xd   : > { %p697_p8 = pnand %p696_p7, %p695_p6 }
   0xf   : > { %p698_p9 = pneg %p697_p8 }
  0x11   : > { %p703_p11 = pnand %p701_p10, %p698_p9 }
  0x13   : > { %706 = shalt.err (!%p703_p11)
}
  0x14   : > { %s707_s25 = scalar_lea.vmem %s126_s15, 2304  ;;  %p715_p1 = scmp.lt.s32.totalorder %s126_s15, %s126_s15 }
  0x15   : > { %p708_p12 = scmp.ne.s32.totalorder %s126_s15, %s707_s25  ;;  %p716_p4 = scmp.lt.s32.totalorder %s707_s25, %s707_s25 }
  0x17   : > { %p710_p13 = pnand %p708_p12, %p696_p7  ;;  %p717_p3 = por %p716_p4, %p715_p1 }
  0x19   : > { %p711_p0 = pneg %p710_p13 }
  0x1b   : > { %p718_p2 = pnand %p717_p3, %p711_p0 }
  0x1d   : > { %721 = shalt.err (!%p718_p2)
}
  0x1e   : > { %s735_s26 = smov 64   ;;  %s736_s27 = smov 4  }
  0x1f   : > { %656 = dma.hbm_to_vmem [thread:$0]  (!%p778_p5), %s853_s1, 2304, %s126_s15, [#allocation3], %s735_s26, %s735_s26, %s736_s27  }
  0x20   : > { %p860_p6 = scmp.ne.s32.totalorder %s858_s16, 0 }
  0x21   : > { %p861_p8 = scmp.eq.s32.totalorder (!%p860_p6), %s765_s13, 0 }
  0x22   : > { %151 = sbr.rel (%p860_p6) target bundleno = 732 (0x2dc), region = 32 }
  0x29   : > { %727 = dma.done.wait (%p861_p8), [#allocation3], 2304   ;;  %p862_p7 = pmov %p861_p8 }
  0x2a   : > { %p173_p2 = scmp.lt.s32.totalorder %s765_s13, 1  ;;  %v737_v0 = vmov 0.0   ;;  %vm738_vm0 = vmmov 0   ;;  %v672_v1 = vld [vmem:[#allocation2] sm:$0xff]   ;;  %v673_v2 = vld [vmem:[#allocation2 + $0x8] sm:$0xff]   ;;  %v674_v3 = vld [vmem:[#allocation2 + $0x10] sm:$0xff]   ;;  %v475_v45 = vlaneseq }
  0x2b   : > { %729 = vsyncadd (%p862_p7), [#allocation3], 4294964992  ;;  %601 = vmatprep.subr.bf16.mxu0 %v737_v0  ;;  %605 = vmatprep.mubr.msk.bf16.mxu0 %vm738_vm0, %v737_v0  ;;  %vm204_vm1 = vcmask 261120   ;;  %v675_v4 = vld [vmem:[#allocation2 + $0x18] sm:$0xff]   ;;  %v676_v6 = vld [vmem:[#allocation2 + $0x20] sm:$0xff]  }
  0x2c   : > { %609 = vmatprep.subr.bf16.mxu1 %v737_v0  ;;  %625 = vmatprep.mubr.msk.bf16.mxu1 %vm738_vm0, %v737_v0  ;;  %s864_s13 = smov (!%p173_p2, %s765_s13), 1  ;;  %v677_v7 = vld [vmem:[#allocation2 + $0x28] sm:$0xff]   ;;  %v678_v8 = vld [vmem:[#allocation2 + $0x30] sm:$0xff]   ;;  %v679_v9 = vld [vmem:[#allocation2 + $0x38] sm:$0xff]   ;;  %v476_v47 = vand.u32 127, %v475_v45 }
  0x2d   : > { %s554_s30 = sshll.u32 %s864_s13, 2  ;;  %602 = vmatpush3.bf16.msra.mxu0 %v672_v1  ;;  %610 = vmatpush3.bf16.msra.mxu1 %v674_v3  ;;  %v680_v10 = vld [vmem:[#allocation2 + $0x40] sm:$0xff]   ;;  %v681_v11 = vld [vmem:[#allocation2 + $0x48] sm:$0xff]   ;;  %v682_v12 = vld [vmem:[#allocation2 + $0x50] sm:$0xff]   ;;  %s555_s15 = sshll.u32 %s864_s13, 3 }
  0x2e   : > { %603 = vmatprep.subr.bf16.mxu0 %v737_v0  ;;  %s176_s6 = scalar_lea.vmem %s852_s0, %s554_s30  ;;  %611 = vmatprep.subr.bf16.mxu1 %v737_v0  ;;  %v683_v13 = vld [vmem:[#allocation2 + $0x58] sm:$0xff]   ;;  %v684_v14 = vld [vmem:[#allocation2 + $0x60] sm:$0xff]   ;;  %v685_v15 = vld [vmem:[#allocation2 + $0x68] sm:$0xff]   ;;  %vm477_vm2 = vcmp.ge.s32.totalorder %v476_v47, 17  ;;  %vm478_vm3 = vcmp.lt.s32.totalorder %v476_v47, 20  ;;  %s180_s18 = scalar_lea.vmem %s855_s3, %s555_s15 }
  0x2f   : > { %v182_v5 = vld [vmem:[%s176_s6] sm:$0xf]  ;;  %v687_v17 = vld [vmem:[#allocation2 + $0x78] sm:$0xff]   ;;  %v688_v26 = vld [vmem:[#allocation2 + $0x80] sm:$0xff]  }
  0x30   : > { %v686_v16 = vld [vmem:[#allocation2 + $0x70] sm:$0xff]   ;;  %v689_v27 = vld [vmem:[#allocation2 + $0x88] sm:$0xff]   ;;  %vm479_vm4 = vmand %vm477_vm2, %vm478_vm3 }
  0x31   : > { %604 = vmatpush3.bf16.msra.mxu0 %v673_v2  ;;  %612 = vmatpush3.bf16.msra.mxu1 %v675_v4  ;;  %v556_v18 = vld [vmem:[%s854_s2] ss:$0 sm:$0xff]  ;;  %v560_v28 = vld [vmem:[%s854_s2 + $0x1] ss:$0 sm:$0xff]  ;;  %v569_v36 = vld [vmem:[%s854_s2 + $0x2] ss:$0 sm:$0xff] }
  0x32   : > { %629 = vmatprep.subr.bf16.mxu0 %v737_v0  ;;  %613 = vmatprep.subr.bf16.mxu1 %v737_v0 }
  0x34   : > { %606 = vmatmul.mubr.msk.bf16.vlgmr.msra.gmra.mrb[0].mxu0 %vm204_vm1, %v182_v5 }
  0x35   : > { %645 = vmatprep.mubr.msk.bf16.mxu0 %vm738_vm0, %v737_v0  ;;  %614 = vmatpush3.bf16.msra.mxu1 %v676_v6 }
  0x36   : > { %615 = vmatprep.subr.bf16.mxu1 %v737_v0  ;;  %630 = vmatpush3.bf16.msra.mxu0 %v682_v12 }
  0x37   : > { %631 = vmatprep.subr.bf16.mxu0 %v737_v0 }
  0x39   : > { %616 = vmatpush3.bf16.msra.mxu1 %v677_v7 }
  0x3a   : > { %617 = vmatprep.subr.bf16.mxu1 %v737_v0  ;;  %632 = vmatpush3.bf16.msra.mxu0 %v683_v13 }
  0x3b   : > { %633 = vmatprep.subr.bf16.mxu0 %v737_v0 }
  0x3d   : > { %618 = vmatpush3.bf16.msra.mxu1 %v678_v8 }
  0x3e   : > { %619 = vmatprep.subr.bf16.mxu1 %v737_v0  ;;  %634 = vmatpush3.bf16.msra.mxu0 %v684_v14 }
  0x3f   : > { %635 = vmatprep.subr.bf16.mxu0 %v737_v0 }
  0x41   : > { %620 = vmatpush3.bf16.msra.mxu1 %v679_v9 }
  0x42   : > { %621 = vmatprep.subr.bf16.mxu1 %v737_v0  ;;  %636 = vmatpush3.bf16.msra.mxu0 %v685_v15 }
  0x43   : > { %637 = vmatprep.subr.bf16.mxu0 %v737_v0 }
  0x45   : > { %622 = vmatpush3.bf16.msra.mxu1 %v680_v10 }
  0x46   : > { %623 = vmatprep.subr.bf16.mxu1 %v737_v0  ;;  %638 = vmatpush3.bf16.msra.mxu0 %v686_v16 }
  0x47   : > { %639 = vmatprep.subr.bf16.mxu0 %v737_v0 }
  0x49   : > { %624 = vmatpush3.bf16.msra.mxu1 %v681_v11 }
  0x4a   : > { %640 = vmatpush3.bf16.msra.mxu0 %v687_v17 }
  0x4b   : > { %641 = vmatprep.subr.bf16.mxu0 %v737_v0 }
  0x4e   : > { %642 = vmatpush3.bf16.msra.mxu0 %v688_v26 }
  0x4f   : > { %643 = vmatprep.subr.bf16.mxu0 %v737_v0 }
  0x52   : > { %644 = vmatpush3.bf16.msra.mxu0 %v689_v27 }
 0x107   : > { %v242_v19 = vpop.f32.mrb[0].mxu0 }
 0x108   : > { %v243_v20 = vadd.f32 %v556_v18, %v242_v19  ;;  %v607_v21 = vpop.f32.mrb[1].mxu0 }
 0x109   : > { %v245_v22 = vpop.f32.mrb[2].mxu0 }
 0x10a   : > { %v248_v23 = vmax.f32 %v243_v20, 0.0  ;;  %v608_v24 = vpop.f32.mrb[3].mxu0 }
 0x10c   : > { %v249_v25 = vpack.c.bf16 %v248_v23, %v248_v23 }
 0x10e   : > { %626 = vmatmul.mubr.bf16.vlgmr.msra.gmra.mrb[0].mxu1 %v249_v25 }
 0x1e1   : > { %v353_v29 = vpop.f32.mrb[0].mxu1 }
 0x1e2   : > { %v354_v30 = vadd.f32 %v560_v28, %v353_v29  ;;  %v627_v31 = vpop.f32.mrb[1].mxu1 }
 0x1e3   : > { %v356_v32 = vpop.f32.mrb[2].mxu1 }
 0x1e4   : > { %v359_v33 = vmax.f32 %v354_v30, 0.0  ;;  %v628_v34 = vpop.f32.mrb[3].mxu1 }
 0x1e6   : > { %v360_v35 = vpack.c.bf16 %v359_v33, %v359_v33 }
 0x1e8   : > { %646 = vmatmul.mubr.bf16.vlgmr.msra.gmra.mrb[4].mxu0 %v360_v35 }
 0x2bb   : > { %v464_v37 = vpop.f32.mrb[4].mxu0 }
 0x2bc   : > { %v465_v38 = vadd.f32 %v569_v36, %v464_v37  ;;  %v647_v39 = vpop.f32.mrb[5].mxu0 }
 0x2bd   : > { %v467_v40 = vpop.f32.mrb[6].mxu0 }
 0x2be   : > { %v470_v41 = vsub.f32 0.0, %v465_v38  ;;  %v648_v42 = vpop.f32.mrb[7].mxu0 }
 0x2c0   : > { %v471_v43 = vmul.f32 1.442695, %v470_v41 }
 0x2c2   : > { %690 = vpow2.f32 %v471_v43 }
 0x2cc   : > { %v691_v44 = vpop.eup %690 }
 0x2cd   : > { %v473_v46 = vadd.f32 1.0, %v691_v44 }
 0x2cf   : > { %692 = vrcp.f32 %v473_v46 }
 0x2d9   : > { %v693_v48 = vpop.eup %692 }
 0x2da   : > { %v480_v49 = vsel %vm479_vm4, %v693_v48, %v465_v38 }
 0x2db   : > { %481 = vst [vmem:[%s180_s18] sm:$0xff] %v480_v49 }
 0x2dc PF: > { %s14_s12 = sadd.s32 1, %s732_s12  }
 0x2dd   : > { %p11_p3 = scmp.ge.s32.totalorder %s14_s12, 4  }
 0x2df   :  { %13 = sbr.rel (!%p11_p3) target bundleno = 1 (0x1), region = 67 }
 0x2e6   :  { %501 = vsyncpa [#allocation3], 1 }
 0x2e7   :  { %503 = vsyncpa [#allocation3 + $0x1], 1 }

</bundles_post_ra>
